<compile_context>
chip_gen: v6e
topology: v6e:2x2x1
jax: 0.10.0
libtpu: 0.0.40
codegen_flags: <defaults>
</compile_context>

<pallas_src>
import functools

import jax
import jax.numpy as jnp
from jax.experimental import pallas as pl
from jax.experimental.pallas import tpu as pltpu

_SUBLANE = 8
_LANE = 128


def _round_up(x, m):
    return (x + m - 1) // m * m


def _pick_h_tile(h_pad):
    # Largest MXU/lane-friendly tile that divides the padded H.
    for tn in (512, 256, 128):
        if h_pad % tn == 0:
            return tn
    return h_pad


def _proj_kernel(x_ref, w_ref, b_ref, o_ref):
    # x_ref: (B_pad, D) f32   w_ref: (D, tn) bf16   b_ref: (1, tn) f32   o_ref: (B_pad, tn) f32
    x_bf16 = x_ref[...].astype(jnp.bfloat16)          # tiny cast; weight stays bf16 from init
    acc = jnp.dot(x_bf16, w_ref[...], preferred_element_type=jnp.float32)  # MXU, f32 accumulate
    o_ref[...] = (acc + b_ref[...]).astype(o_ref.dtype)                    # f32 bias add


@functools.partial(jax.jit, static_argnums=(3,))
def output_projection(pooled, weight_t_bf16, bias_pad, out_h):
    """Pallas equivalent of nn.Linear: pooled @ W^T + b.

    pooled:        (B, D)       float32  (CLIP pooler_output stand-in)
    weight_t_bf16: (D, H_pad)   bfloat16 (pre-transposed, H zero-padded to multiple of 128)
    bias_pad:      (1, H_pad)   float32  (zero-padded)
    out_h:         original H (static)   -> returns (B, out_h) float32
    """
    B, D = pooled.shape
    H_pad = weight_t_bf16.shape[1]
    tn = _pick_h_tile(H_pad)

    # Pad batch to a sublane multiple so the x / out blocks satisfy the (8, 128) rule.
    B_pad = max(_round_up(B, _SUBLANE), _SUBLANE)
    x = pooled if B_pad == B else jnp.pad(pooled, ((0, B_pad - B), (0, 0)))

    out = pl.pallas_call(
        _proj_kernel,
        out_shape=jax.ShapeDtypeStruct((B_pad, H_pad), jnp.float32),
        grid_spec=pltpu.PrefetchScalarGridSpec(
            num_scalar_prefetch=0,
            grid=(H_pad // tn,),
            in_specs=[
                # x is revisited for every H tile (same block index -> no re-DMA).
                pl.BlockSpec((B_pad, D), lambda j: (0, 0)),
                pl.BlockSpec((D, tn), lambda j: (0, j)),
                pl.BlockSpec((1, tn), lambda j: (0, j)),
            ],
            out_specs=pl.BlockSpec((B_pad, tn), lambda j: (0, j)),
        ),
        compiler_params=pltpu.CompilerParams(
            # H tiles are independent -> shard across both TensorCores on v7x.
            dimension_semantics=("parallel",),
        ),
    )(x, weight_t_bf16, bias_pad)

    # Strip batch/lane padding (padded columns are exactly zero anyway).
    return out[:B, :out_h]


class TextEmbedderPallas:
    """Synthetic re-implementation of TextEmbedder.forward's tensor compute."""

    def __init__(self, clip_hidden_size, hidden_size, key):
        k_w, k_b = jax.random.split(key)
        # nn.Linear(output_dim, hidden_size): weight (hidden, output_dim), bias (hidden,)
        bound = 1.0 / (clip_hidden_size ** 0.5)
        w = jax.random.uniform(
            k_w, (hidden_size, clip_hidden_size), jnp.float32, -bound, bound
        )
        b = jax.random.uniform(k_b, (hidden_size,), jnp.float32, -bound, bound)

        self.hidden_size = hidden_size
        h_pad = max(_round_up(hidden_size, _LANE), _LANE)

        # f32 masters kept only for reference checks.
        self.weight_t_f32 = jnp.asarray(w.T)            # (D, H)
        self.bias_f32 = b                               # (H,)

        # Hot-path layout work done ONCE at init: transpose, pad H to lane multiple, cast to bf16.
        wt_pad = jnp.zeros((clip_hidden_size, h_pad), jnp.float32)
        wt_pad = wt_pad.at[:, :hidden_size].set(self.weight_t_f32)
        self.weight_t = wt_pad.astype(jnp.bfloat16)     # (D, H_pad) bf16

        bias_pad = jnp.zeros((1, h_pad), jnp.float32)
        self.bias_pad = bias_pad.at[:, :hidden_size].set(b)  # (1, H_pad) f32

    def __call__(self, pooled_embeddings):
        # pooled_embeddings: (B, D_clip) -- stand-in for CLIP pooler_output
        return output_projection(
            pooled_embeddings, self.weight_t, self.bias_pad, self.hidden_size
        )


if __name__ == "__main__":
    key = jax.random.PRNGKey(0)
    k_params, k_pooled = jax.random.split(key)

    batch = 2
    clip_hidden = 64   # stands in for CLIP text-model hidden size (1024 for ViT-H/14)
    hidden_size = 32   # TextEmbedder output hidden_size

    embedder = TextEmbedderPallas(clip_hidden, hidden_size, k_params)

    # Deterministic stand-in for FrozenCLIPEmbedder(...)[1] (pooler_output), shape (B, D_clip).
    pooled = jax.random.normal(k_pooled, (batch, clip_hidden), jnp.float32)

    out = jax.block_until_ready(embedder(pooled))
    assert out.shape == (batch, hidden_size)

    # Reference with the same bf16-input / f32-accumulate numerics as the kernel.
    ref_bf16 = (
        jnp.dot(
            pooled.astype(jnp.bfloat16),
            embedder.weight_t_f32.astype(jnp.bfloat16),
            preferred_element_type=jnp.float32,
        )
        + embedder.bias_f32
    )
    assert jnp.allclose(out, ref_bf16, atol=1e-3, rtol=1e-3)

    # Loose check against the full-f32 nn.Linear semantics (bf16 weight rounding only).
    ref_f32 = pooled @ embedder.weight_t_f32 + embedder.bias_f32
    assert jnp.allclose(out, ref_f32, atol=5e-2, rtol=5e-2)

    print("KERNEL_OK")
</pallas_src>

<mosaic_0001>
module attributes {stable_mosaic.version = 11 : i64} {
  func.func @_proj_kernel(%arg0: i32, %arg1: memref<8x64xf32, #tpu.memory_space<vmem>>, %arg2: memref<64x128xbf16, #tpu.memory_space<vmem>>, %arg3: memref<1x128xf32, #tpu.memory_space<vmem>>, %arg4: memref<8x128xf32, #tpu.memory_space<vmem>>) attributes {dimension_semantics = [#tpu.dimension_semantics<parallel>], iteration_bounds = array<i64: 1>, scalar_prefetch = 0 : i64, scratch_operands = 0 : i64, tpu.core_type = #tpu.core_type<tc>, window_params = [{pipeline_mode = #tpu.pipeline_mode<synchronous>, transform_indices = @transform_0, window_bounds = array<i64: 8, 64>}, {transform_indices = @transform_1, window_bounds = array<i64: 64, 128>}, {transform_indices = @transform_2, window_bounds = array<i64: 1, 128>}, {transform_indices = @transform_3, window_bounds = array<i64: 8, 128>}]} {
    %c0 = arith.constant 0 : index
    %c0_0 = arith.constant 0 : index
    %0 = vector.load %arg1[%c0, %c0_0] : memref<8x64xf32, #tpu.memory_space<vmem>>, vector<8x64xf32>
    %1 = arith.truncf %0 : vector<8x64xf32> to vector<8x64xbf16>
    %c0_1 = arith.constant 0 : index
    %c0_2 = arith.constant 0 : index
    %2 = vector.load %arg2[%c0_1, %c0_2] : memref<64x128xbf16, #tpu.memory_space<vmem>>, vector<64x128xbf16>
    %cst = arith.constant dense<0.000000e+00> : vector<8x128xf32>
    %3 = tpu.matmul %1, %2, %cst {dimension_numbers = #tpu.dot_dimension_numbers<[1], [0], [0], [1], [0, 0, 1, 1], [], []>} : vector<8x64xbf16>, vector<64x128xbf16>, vector<8x128xf32> -> vector<8x128xf32>
    %c0_3 = arith.constant 0 : index
    %c0_4 = arith.constant 0 : index
    %4 = vector.load %arg3[%c0_3, %c0_4] : memref<1x128xf32, #tpu.memory_space<vmem>>, vector<1x128xf32>
    %5 = vector.broadcast %4 : vector<1x128xf32> to vector<8x128xf32>
    %6 = arith.addf %3, %5 : vector<8x128xf32>
    %c0_5 = arith.constant 0 : index
    %c0_6 = arith.constant 0 : index
    %7 = vector.load %arg4[%c0_5, %c0_6] : memref<8x128xf32, #tpu.memory_space<vmem>>, vector<8x128xf32>
    tpu.vector_store %arg4[%c0_5, %c0_6], %6 {strides = array<i32>} : memref<8x128xf32, #tpu.memory_space<vmem>>, vector<8x128xf32>,
    return
  }
  func.func @transform_0(%arg0: i32) -> (i32, i32) {
    %c0_i32 = arith.constant 0 : i32
    %c0_i32_0 = arith.constant 0 : i32
    %c0_i32_1 = arith.constant 0 : i32
    return %c0_i32, %c0_i32_0 : i32, i32
  }
  func.func @transform_1(%arg0: i32) -> (i32, i32) {
    %c0_i32 = arith.constant 0 : i32
    %c0_i32_0 = arith.constant 0 : i32
    return %c0_i32, %arg0 : i32, i32
  }
  func.func @transform_2(%arg0: i32) -> (i32, i32) {
    %c0_i32 = arith.constant 0 : i32
    %c0_i32_0 = arith.constant 0 : i32
    return %c0_i32, %arg0 : i32, i32
  }
  func.func @transform_3(%arg0: i32) -> (i32, i32) {
    %c0_i32 = arith.constant 0 : i32
    %c0_i32_0 = arith.constant 0 : i32
    return %c0_i32, %arg0 : i32, i32
  }
}

</mosaic_0001>

<bundles_post_ra>
// kernel: output_projection.1
= control target key start
LH: loop header
LB: loop body
LE: loop exit
PB: predicated region body
PF: predicated region fallthrough
CT: control target
= control target key end

     0   :  { %8 = vsyncpa [#allocation3], 0  ;;  %s174_s12 = smov [#allocation2]   ;;  %s211_s0 = inlined_call_operand.vmem [shape: f32[8,64], index: 0, kind: input, shape index: {}]   ;;  %s212_s1 = inlined_call_operand.hbm [shape: bf16[64,128], index: 1, kind: input, shape index: {}]   ;;  %s213_s2 = inlined_call_operand.vmem [shape: f32[1,128], index: 2, kind: input, shape index: {}]   ;;  %s214_s3 = inlined_call_operand.vmem [shape: f32[8,128], index: 3, kind: output, shape index: {}]  }
   0x1   :  { %s16_s13 = sshll.u32 %s174_s12, 4  ;;  %s17_s13 = int_to_ptr.vmem [resolvable:$true] %s16_s13 }
   0x2   :  { %s160_s14 = scalar_lea.vmem %s17_s13, 512  ;;  %p165_p1 = scmp.lt.s32.totalorder %s17_s13, %s17_s13 }
   0x3   :  { %p161_p0 = scmp.ne.s32.totalorder %s17_s13, %s160_s14  ;;  %p166_p2 = scmp.lt.s32.totalorder %s160_s14, %s160_s14 }
   0x5   :  { %p167_p3 = por %p166_p2, %p165_p1 }
   0x7   :  { %p168_p4 = pnand %p167_p3, %p161_p0 }
   0x9   :  { %171 = shalt.err (!%p168_p4)
}
   0xa   :  { %s175_s15 = smov 64   ;;  %s176_s16 = smov 4  }
   0xb   :  { %22 = dma.hbm_to_vmem [thread:$0]  %s212_s1, 512, %s17_s13, [#allocation3], %s175_s15, %s175_s15, %s176_s16  }
   0xc   :  { %172 = dma.done.wait [#allocation3], 512  }
   0xd   :  { %173 = vsyncadd [#allocation3], 4294966784  ;;  %v177_v0 = vmov 0.0   ;;  %vm178_vm0 = vmmov 0   ;;  %v148_v1 = vld [vmem:[#allocation2 + $0x18] sm:$0xff]   ;;  %v149_v2 = vld [vmem:[#allocation2 + $0x10] sm:$0xff]  }
   0xe   :  { %131 = vmatprep.subr.bf16.mxu0 %v177_v0  ;;  %139 = vmatprep.mubr.msk.bf16.mxu0 %vm178_vm0, %v177_v0  ;;  %v150_v3 = vld [vmem:[#allocation2 + $0x8] sm:$0xff]   ;;  %v151_v4 = vld [vmem:[#allocation2] sm:$0xff]   ;;  %vm70_vm1 = vcmask 523264  }
   0xf   :  { %132 = vmatpush3.bf16.msra.mxu0 %v148_v1  ;;  %v29_v5 = vld [vmem:[%s211_s0] sm:$0xff] }
  0x10   :  { %133 = vmatprep.subr.bf16.mxu0 %v177_v0  ;;  %v30_v6 = vpack.c.bf16 %v29_v5, %v29_v5  ;;  %v120_v7 = vld [vmem:[%s213_s2] ss:$0 sm:$0xff] }
  0x13   :  { %134 = vmatpush3.bf16.msra.mxu0 %v149_v2 }
  0x14   :  { %135 = vmatprep.subr.bf16.mxu0 %v177_v0 }
  0x17   :  { %136 = vmatpush3.bf16.msra.mxu0 %v150_v3 }
  0x18   :  { %137 = vmatprep.subr.bf16.mxu0 %v177_v0 }
  0x1b   :  { %138 = vmatpush3.bf16.msra.mxu0 %v151_v4 }
  0x1e   :  { %140 = vmatmul.mubr.msk.bf16.vlgmr.msra.gmra.mxu0 %vm70_vm1, %v30_v6 }
  0xde   :  { %v108_v8 = vpop.f32.mrf.mxu0 }
  0xdf   :  { %v109_v9 = vadd.f32 %v120_v7, %v108_v8 }
  0xe0   :  { %v141_v10 = vpop.f32.mrf.mxu0 }
  0xe1   :  { %114 = vst [vmem:[%s214_s3] sm:$0xff] %v109_v9 }
  0xe2   :  { %v111_v11 = vpop.f32.mrf.mxu0 }
  0xe4   :  { %v142_v12 = vpop.f32.mrf.mxu0 }
  0xe5   :  { %119 = vsyncpa [#allocation3], 1 }

</bundles_post_ra>
